<compile_context>
chip_gen: v7x
topology: tpu7x:2x2x1
jax: 0.10.0
libtpu: 0.0.40
codegen_flags: <defaults>
</compile_context>

<pallas_src>
import jax
import jax.numpy as jnp
from jax.experimental import pallas as pl
from jax.experimental.pallas import tpu as pltpu

_LANE = 128      # vreg lane width
_SUBLANE = 8     # vreg sublane count (f32)

# Conservative per-call VMEM budget for kernel operands (double-buffered).
# Fits v5e's 16 MiB default scoped VMEM with headroom; trivially fits the
# 32 MiB defaults on v6e / v7x, so no vmem_limit_bytes override is required.
_VMEM_BUDGET = 12 * 1024 * 1024


def _round_up(x: int, m: int) -> int:
    return (x + m - 1) // m * m


# ----------------------------------------------------------------------------
# Kernels
# ----------------------------------------------------------------------------
def _mtlr_kernel(x_ref, w_ref, b_ref, o_ref):
    # Single-K-block path: x_ref (tm, F), w_ref (F, T), b_ref (1, T), o_ref (tm, T)
    acc = jnp.dot(x_ref[...], w_ref[...], preferred_element_type=jnp.float32)
    o_ref[...] = (acc + b_ref[...]).astype(o_ref.dtype)


def _mtlr_kernel_ktiled(x_ref, w_ref, b_ref, o_ref, acc_ref):
    # K-tiled path: x_ref (tm, tk), w_ref (tk, T), acc_ref (tm, T) f32 scratch.
    k = pl.program_id(1)

    @pl.when(k == 0)
    def _():
        acc_ref[...] = jnp.zeros_like(acc_ref)

    acc_ref[...] += jnp.dot(x_ref[...], w_ref[...],
                            preferred_element_type=jnp.float32)

    @pl.when(k == pl.num_programs(1) - 1)
    def _():
        o_ref[...] = (acc_ref[...] + b_ref[...]).astype(o_ref.dtype)


# ----------------------------------------------------------------------------
# Tile planning
# ----------------------------------------------------------------------------
def _plan_tiles(N, F, T, x_itemsize, w_itemsize, out_itemsize=4):
    """Pick (tm, tk). tk is None when the whole reduction dim stays resident."""

    def fits(tm, tk, with_acc):
        b = 2 * tm * tk * x_itemsize          # x tile, double-buffered
        b += 2 * tk * T * w_itemsize          # weight tile (2x: pipeline bufs)
        b += 2 * T * 4                        # bias
        b += 2 * tm * T * out_itemsize        # output tile, double-buffered
        if with_acc:
            b += tm * T * 4                   # f32 accumulator scratch
        return b <= _VMEM_BUDGET

    tm_cap = min(1024, _round_up(max(N, 1), _SUBLANE))
    if N >= 16:
        # Keep at least two grid steps so v7x's second TensorCore has work;
        # neutral on single-core v5e / v6e.
        tm_cap = min(tm_cap, _round_up(pl.cdiv(N, 2), _SUBLANE))
    tm_candidates = [t for t in (1024, 512, 256, 128, 64, 32, 16, 8)
                     if t <= tm_cap] or [_SUBLANE]

    # Path 1: whole reduction dim resident (no K grid axis).
    for tm in tm_candidates:
        if fits(tm, F, with_acc=False):
            return tm, None

    # Path 2: K-tiling (tk must divide F so no OOB garbage enters the dot).
    for tk in (512, 256, 128):
        if F % tk != 0:
            continue
        for tm in tm_candidates:
            if fits(tm, tk, with_acc=True):
                return tm, tk

    # Fallback: smallest row tile, full reduction dim.
    # TODO(synk): handle F not divisible by any tk with in-kernel K masking.
    return _SUBLANE, None


# ----------------------------------------------------------------------------
# Public API
# ----------------------------------------------------------------------------
def fold_mtlr_params(weight, bias, G, *, param_dtype=jnp.float32):
    """Fold G (and bias) into the weights. Run ONCE per weight set.

    Returns (w_fold, b_fold) with w_fold = W @ G (cast to param_dtype, e.g.
    bf16 for the bandwidth-bound large-N regime) and b_fold = (b @ G) kept in
    f32 since it is added to the f32 accumulator.
    """
    Gf = jnp.asarray(G, jnp.float32)
    w_fold = jnp.asarray(weight, jnp.float32) @ Gf
    b_fold = jnp.asarray(bias, jnp.float32) @ Gf
    return w_fold.astype(param_dtype), b_fold.reshape(1, -1).astype(jnp.float32)


def mtlr_forward(x, w_fold, b_fold):
    """MTLR forward on pre-folded parameters: x @ w_fold + b_fold.

    x: (N, F); w_fold: (F, T); b_fold: (1, T) or (T,).
    Returns (N, T) float32 logits, equal (up to f32 reassociation) to
    (x @ W + b) @ G of the original module.
    """
    N, F = x.shape
    T = w_fold.shape[-1]
    b_fold = b_fold.reshape(1, T)

    x_isz = jnp.dtype(x.dtype).itemsize
    w_isz = jnp.dtype(w_fold.dtype).itemsize
    tm, tk = _plan_tiles(N, F, T, x_isz, w_isz)

    n_m = pl.cdiv(N, tm)

    if tk is None:
        grid = (n_m,)
        in_specs = [
            pl.BlockSpec((tm, F), lambda i: (i, 0)),    # x row tile (pipelined)
            pl.BlockSpec((F, T), lambda i: (0, 0)),     # folded weights, resident
            pl.BlockSpec((1, T), lambda i: (0, 0)),     # folded bias, resident
        ]
        out_specs = pl.BlockSpec((tm, T), lambda i: (i, 0))
        kernel = _mtlr_kernel
        scratch = []
        dims = ("parallel",)
    else:
        grid = (n_m, F // tk)
        in_specs = [
            pl.BlockSpec((tm, tk), lambda i, k: (i, k)),
            pl.BlockSpec((tk, T), lambda i, k: (k, 0)),
            pl.BlockSpec((1, T), lambda i, k: (0, 0)),
        ]
        out_specs = pl.BlockSpec((tm, T), lambda i, k: (i, 0))
        kernel = _mtlr_kernel_ktiled
        scratch = [pltpu.VMEM((tm, T), jnp.float32)]
        dims = ("parallel", "arbitrary")

    cost = pl.CostEstimate(
        flops=2 * N * F * T,
        transcendentals=0,
        bytes_accessed=N * F * x_isz + F * T * w_isz + T * 4 + N * T * 4,
    )

    return pl.pallas_call(
        kernel,
        out_shape=jax.ShapeDtypeStruct((N, T), jnp.float32),
        grid_spec=pltpu.PrefetchScalarGridSpec(
            num_scalar_prefetch=0,
            grid=grid,
            in_specs=in_specs,
            out_specs=out_specs,
            scratch_shapes=scratch,
        ),
        compiler_params=pltpu.CompilerParams(dimension_semantics=dims),
        cost_estimate=cost,
    )(x, w_fold, b_fold)


def make_mtlr_params(key, in_features, num_time_bins):
    """Deterministic synthetic parameters matching MTLR.__init__/reset_parameters."""
    # Xavier (Glorot) normal: std = sqrt(2 / (fan_in + fan_out))
    std = (2.0 / (in_features + num_time_bins)) ** 0.5
    weight = jax.random.normal(key, (in_features, num_time_bins),
                               dtype=jnp.float32) * std
    bias = jnp.zeros((num_time_bins,), dtype=jnp.float32)
    G = jnp.tril(jnp.ones((num_time_bins, num_time_bins), dtype=jnp.float32))
    return weight, bias, G


if __name__ == "__main__":
    # Small shapes consistent with the module: a batch of feature vectors.
    N = 8            # num_samples
    F = 32           # in_features
    T = 8            # num_time_bins

    key = jax.random.PRNGKey(0)
    kx, kw = jax.random.split(key)

    x = jax.random.normal(kx, (N, F), dtype=jnp.float32)
    weight, bias, G = make_mtlr_params(kw, F, T)

    # Fold once per weight set (hoisted out of the per-batch forward).
    w_fold, b_fold = fold_mtlr_params(weight, bias, G)

    out = mtlr_forward(x, w_fold, b_fold)
    out = jax.block_until_ready(out)

    # Reference check in plain JAX (same math as the PyTorch forward).
    ref = (x @ weight + bias) @ G
    assert out.shape == (N, T)
    assert jnp.allclose(out, ref, atol=1e-4, rtol=1e-4)

    print("KERNEL_OK")
</pallas_src>

<mosaic_0001>
module attributes {stable_mosaic.version = 11 : i64} {
  func.func @_mtlr_kernel(%arg0: i32, %arg1: memref<8x32xf32, #tpu.memory_space<vmem>>, %arg2: memref<32x8xf32, #tpu.memory_space<vmem>>, %arg3: memref<1x8xf32, #tpu.memory_space<vmem>>, %arg4: memref<8x8xf32, #tpu.memory_space<vmem>>) attributes {dimension_semantics = [#tpu.dimension_semantics<parallel>], iteration_bounds = array<i64: 1>, scalar_prefetch = 0 : i64, scratch_operands = 0 : i64, tpu.core_type = #tpu.core_type<tc>, window_params = [{transform_indices = @transform_0, window_bounds = array<i64: 8, 32>}, {pipeline_mode = #tpu.pipeline_mode<synchronous>, transform_indices = @transform_1, window_bounds = array<i64: 32, 8>}, {pipeline_mode = #tpu.pipeline_mode<synchronous>, transform_indices = @transform_2, window_bounds = array<i64: 1, 8>}, {transform_indices = @transform_3, window_bounds = array<i64: 8, 8>}]} {
    %c0 = arith.constant 0 : index
    %c0_0 = arith.constant 0 : index
    %0 = vector.load %arg1[%c0, %c0_0] : memref<8x32xf32, #tpu.memory_space<vmem>>, vector<8x32xf32>
    %c0_1 = arith.constant 0 : index
    %c0_2 = arith.constant 0 : index
    %1 = vector.load %arg2[%c0_1, %c0_2] : memref<32x8xf32, #tpu.memory_space<vmem>>, vector<32x8xf32>
    %cst = arith.constant dense<0.000000e+00> : vector<8x8xf32>
    %2 = tpu.matmul %0, %1, %cst {dimension_numbers = #tpu.dot_dimension_numbers<[1], [0], [0], [1], [0, 0, 1, 1], [], []>} : vector<8x32xf32>, vector<32x8xf32>, vector<8x8xf32> -> vector<8x8xf32>
    %c0_3 = arith.constant 0 : index
    %c0_4 = arith.constant 0 : index
    %3 = vector.load %arg3[%c0_3, %c0_4] : memref<1x8xf32, #tpu.memory_space<vmem>>, vector<1x8xf32>
    %4 = vector.broadcast %3 : vector<1x8xf32> to vector<8x8xf32>
    %5 = arith.addf %2, %4 : vector<8x8xf32>
    %c0_5 = arith.constant 0 : index
    %c0_6 = arith.constant 0 : index
    %6 = vector.load %arg4[%c0_5, %c0_6] : memref<8x8xf32, #tpu.memory_space<vmem>>, vector<8x8xf32>
    tpu.vector_store %arg4[%c0_5, %c0_6], %5 {strides = array<i32>} : memref<8x8xf32, #tpu.memory_space<vmem>>, vector<8x8xf32>,
    return
  }
  func.func @transform_0(%arg0: i32) -> (i32, i32) {
    %c0_i32 = arith.constant 0 : i32
    %c0_i32_0 = arith.constant 0 : i32
    return %arg0, %c0_i32 : i32, i32
  }
  func.func @transform_1(%arg0: i32) -> (i32, i32) {
    %c0_i32 = arith.constant 0 : i32
    %c0_i32_0 = arith.constant 0 : i32
    %c0_i32_1 = arith.constant 0 : i32
    return %c0_i32, %c0_i32_0 : i32, i32
  }
  func.func @transform_2(%arg0: i32) -> (i32, i32) {
    %c0_i32 = arith.constant 0 : i32
    %c0_i32_0 = arith.constant 0 : i32
    %c0_i32_1 = arith.constant 0 : i32
    return %c0_i32, %c0_i32_0 : i32, i32
  }
  func.func @transform_3(%arg0: i32) -> (i32, i32) {
    %c0_i32 = arith.constant 0 : i32
    %c0_i32_0 = arith.constant 0 : i32
    return %arg0, %c0_i32 : i32, i32
  }
}

</mosaic_0001>

<bundles_post_ra>
// kernel: tpu_custom_call.1
= control target key start
LH: loop header
LB: loop body
LE: loop exit
PB: predicated region body
PF: predicated region fallthrough
CT: control target
= control target key end

     0   :  { %v169_v3 = vmov 0.0|0.0   ;;  %vm170_vm0 = vmmov 0   ;;  %v171_v6 = vmov 0.0   ;;  %s223_s0 = inlined_call_operand.vmem [shape: f32[8,32], index: 0, kind: input, shape index: {}]   ;;  %s224_s1 = inlined_call_operand.vmem [shape: f32[32,8], index: 1, kind: input, shape index: {}]   ;;  %s225_s2 = inlined_call_operand.vmem [shape: f32[1,8], index: 2, kind: input, shape index: {}]   ;;  %s226_s3 = inlined_call_operand.hbm [shape: f32[8,8], index: 3, kind: output, shape index: {}]  }
   0x1   :  { %v16_v0 = vld [vmem:[%s224_s1] sm:$0xff]  ;;  %v17_v1 = vld [vmem:[%s224_s1 + $0x8] sm:$0xff]  ;;  %v18_v2 = vld [vmem:[%s224_s1 + $0x10] sm:$0xff]  ;;  %135 = vmatprep.subr.bf16.mxu0 %v169_v3  ;;  %132 = vmatprep.mubr.msk.f32.mxu0 %vm170_vm0, %v171_v6 }
   0x2   :  { %v136_v4 = vpack.c.bf16 %v17_v1, %v16_v0  ;;  %v19_v5 = vld [vmem:[%s224_s1 + $0x18] sm:$0xff] }
   0x3   :  { %8 = vsyncpa [#allocation3], 0  ;;  %v139_v7 = vpack.c.bf16 %v19_v5, %v18_v2  ;;  %v15_v8 = vld [vmem:[%s223_s0] sm:$0xff]  ;;  %vm27_vm1 = vcmask 261120   ;;  %s172_s24 = smov [#allocation2]   ;;  %vm101_vm2 = vcmask 64512  }
   0x4   :  { %137 = vmatpush3.bf16.msra.mxu0 %v136_v4  ;;  %v117_v9 = vld [vmem:[%s225_s2] ss:$0 sm:$0xff]  ;;  %s109_s1 = sshll.u32 %s172_s24, 4  ;;  %s110_s1 = int_to_ptr.vmem [resolvable:$true] %s109_s1 }
   0x5   :  { %138 = vmatprep.subr.bf16.mxu0 %v169_v3  ;;  %s145_s25 = scalar_lea.vmem %s110_s1, 128  ;;  %p150_p1 = scmp.lt.s32.totalorder %s110_s1, %s110_s1 }
   0x6   :  { %p146_p0 = scmp.ne.s32.totalorder %s110_s1, %s145_s25  ;;  %p151_p2 = scmp.lt.s32.totalorder %s145_s25, %s145_s25 }
   0x8   :  { %140 = vmatpush3.bf16.msra.mxu0 %v139_v7  ;;  %p152_p3 = por %p151_p2, %p150_p1 }
   0xa   :  { %p153_p4 = pnand %p152_p3, %p146_p0 }
   0xb   :  { %133 = vmatmul.mubr.msk.f32.vlgmr.msra.gmra.mrb[0].mxu0 %vm27_vm1, %v15_v8 }
  0xde   :  { %v97_v10 = vpop.f32.mrb[0].mxu0 }
  0xdf   :  { %v98_v11 = vadd.f32 %v117_v9, %v97_v10  ;;  %v134_v12 = vpop.f32.mrb[1].mxu0 }
  0xe1   :  { %102 = vst.msk [vmem:[#allocation2] sm:$0xff] %vm101_vm2, %v98_v11 }
  0xe2   :  { %156 = shalt.err (!%p153_p4)
}
  0xe3   :  { %s157_s27 = scalar_lea.hbm %s226_s3, 128 }
  0xe4   :  { %p158_p5 = scmp.ne.s32.totalorder %s226_s3, %s157_s27  ;;  %p161_p6 = scmp.lt.u32.totalorder %s157_s27, %s226_s3 }
  0xe6   :  { %p163_p7 = pnand %p161_p6, %p158_p5 }
  0xe8   :  { %166 = shalt.err (!%p163_p7)
}
  0xe9   :  { %112 = dma.vmem_to_hbm [thread:$0]  %s110_s1, 128, %s226_s3, [#allocation3]  }
  0xea   :  { %167 = dma.done.wait [#allocation3], 128  }
  0xeb   :  { %168 = vsyncadd [#allocation3], 4294967168 }
  0xec   :  { %116 = vsyncpa [#allocation3], 1 }

</bundles_post_ra>
